<compile_context>
chip_gen: v7x
topology: tpu7x:2x2x1
jax: 0.10.0
libtpu: 0.0.40
codegen_flags: <defaults>
</compile_context>

<pallas_src>
import functools

import jax
import jax.numpy as jnp
from jax.experimental import pallas as pl
from jax.experimental.pallas import tpu as pltpu


def _round_up(a, m):
    return (a + m - 1) // m * m


def _default_num_shards():
    """2 shards only on v7x (2 TensorCores/chip); 1 on single-core v5e/v6e."""
    try:
        kind = jax.devices()[0].device_kind.lower()
    except Exception:
        return 1
    return 2 if ("v7" in kind or "7x" in kind) else 1


def _global_sa_kernel(tile_first_ref, tile_count_ref, seg_off_ref,
                      xp_ref, w1_ref, b1_ref, w2_ref, b2_ref, *rest,
                      tile_n, tiles_per_shard, negative_slope, apply_scale):
    """Fused MLP (2x Lin+LeakyReLU, BN folded) + segment max into out_ref.

    tile_first/tile_count/seg_off : SMEM scalar-prefetch (int32)
    xp_ref : [tile_n, C+3]   w1_ref: [C+3, H_pad]  w2_ref: [H_pad, CO_pad]
    out_ref: [B_pad, 1, CO_pad]  (resident accumulator across the t axis)
    """
    if apply_scale:
        s2_ref, t2_ref, out_ref = rest
    else:
        t2_ref, out_ref = rest

    t = pl.program_id(1)
    neg_inf = jnp.float32(-jnp.inf)

    @pl.when(t == 0)
    def _init():
        out_ref[...] = jnp.full(out_ref.shape, neg_inf, out_ref.dtype)

    # ---- layer 1: fused [x|pos] @ W1 -> LeakyReLU --------------------------
    h = jnp.dot(xp_ref[...], w1_ref[...], preferred_element_type=jnp.float32)
    h = h + b1_ref[...]
    h = jnp.maximum(h, negative_slope * h)

    # ---- layer 2: Linear (BN1 [and BN2 scale] folded) -> LeakyReLU (+BN2) --
    h = jnp.dot(h.astype(w2_ref.dtype), w2_ref[...],
                preferred_element_type=jnp.float32)
    h = h + b2_ref[...]
    h = jnp.maximum(h, negative_slope * h)
    if apply_scale:
        h = h * s2_ref[...] + t2_ref[...]
    else:
        h = h + t2_ref[...]                                # [tile_n, CO_pad]

    # ---- segment max over only the graphs intersecting this tile ----------
    tile_idx = pl.program_id(0) * tiles_per_shard + t
    row0 = tile_idx * tile_n
    row_ids = jax.lax.broadcasted_iota(jnp.int32, (tile_n, 1), 0)
    g0 = tile_first_ref[tile_idx]
    gcnt = tile_count_ref[tile_idx]

    def body(g, carry):
        start = seg_off_ref[g] - row0
        end = seg_off_ref[g + 1] - row0
        inside = (row_ids >= start) & (row_ids < end)       # [tile_n, 1]
        seg_max = jnp.max(jnp.where(inside, h, neg_inf),
                          axis=0, keepdims=True)            # [1, CO_pad]
        out_ref[g] = jnp.maximum(out_ref[g], seg_max)       # dynamic lead dim
        return carry

    jax.lax.fori_loop(g0, g0 + gcnt, body, 0)


def fold_params(params):
    """Fold BN1 into Linear2; additionally fold BN2 scale when it is positive."""
    w1, b1, s1, t1, w2, b2, s2, t2 = params
    w2f = w2 * s1.reshape(-1, 1)          # row-scale by BN1 scale
    b2f = b2 + t1 @ w2                    # BN1 shift pushed through Linear2
    fold_s2 = bool(jnp.all(s2 > 0))       # LeakyReLU positively homogeneous
    if fold_s2:
        w2f = w2f * s2                    # column-scale by BN2 scale
        b2f = b2f * s2
    return w1, b1, w2f, b2f, s2, t2, fold_s2


def global_sa_module(x, pos, batch, params, *, num_graphs,
                     negative_slope=0.01, max_tile_n=1024, num_shards=None,
                     matmul_dtype=jnp.bfloat16):
    """JAX wrapper reproducing GlobalSAModule.forward (eval mode).

    Requires `batch` sorted / contiguous (standard PyG batch vector).
    """
    n = x.shape[0]
    c_in = x.shape[1] + pos.shape[1]
    if num_shards is None:
        num_shards = _default_num_shards()

    w1, b1, w2f, b2f, s2, t2, fold_s2 = fold_params(params)
    apply_scale = not fold_s2
    hidden = w1.shape[1]
    c_out = w2f.shape[1]

    h_pad = _round_up(hidden, 128)
    co_pad = _round_up(c_out, 128)
    b_pad = _round_up(num_graphs, 8)

    tile_n = min(max_tile_n, _round_up(pl.cdiv(n, num_shards), 8))
    tiles_per_shard = pl.cdiv(n, tile_n * num_shards)
    n_pad = tile_n * num_shards * tiles_per_shard
    num_tiles = num_shards * tiles_per_shard

    def pad2(a, rows, cols, dtype):
        a = jnp.asarray(a, jnp.float32)
        return jnp.pad(a, ((0, rows - a.shape[0]),
                           (0, cols - a.shape[1]))).astype(dtype)

    xp = jnp.concatenate([jnp.asarray(x, jnp.float32),
                          jnp.asarray(pos, jnp.float32)], axis=1)
    xp_p = pad2(xp, n_pad, c_in, matmul_dtype)
    w1_p = pad2(w1, c_in, h_pad, matmul_dtype)
    b1_p = pad2(b1, 1, h_pad, jnp.float32)
    w2_p = pad2(w2f, h_pad, co_pad, matmul_dtype)
    b2_p = pad2(b2f, 1, co_pad, jnp.float32)
    s2_p = pad2(s2, 1, co_pad, jnp.float32)
    t2_p = pad2(t2, 1, co_pad, jnp.float32)

    # ---- scalar-prefetch segment metadata (batch is sorted/contiguous) ----
    counts = jnp.bincount(batch.astype(jnp.int32), length=num_graphs)
    seg_off = jnp.concatenate([jnp.zeros((1,), jnp.int32),
                               jnp.cumsum(counts).astype(jnp.int32)])
    row_starts = jnp.arange(num_tiles, dtype=jnp.int32) * tile_n
    row_ends = jnp.minimum(row_starts + tile_n, n)
    valid = row_ends > row_starts
    tile_first = jnp.clip(
        jnp.searchsorted(seg_off, row_starts, side="right") - 1,
        0, num_graphs - 1)
    tile_last = jnp.clip(
        jnp.searchsorted(seg_off, jnp.maximum(row_ends - 1, 0), side="right") - 1,
        0, num_graphs - 1)
    tile_count = jnp.where(valid, tile_last - tile_first + 1, 0).astype(jnp.int32)
    tile_first = jnp.where(valid, tile_first, 0).astype(jnp.int32)

    operands = [xp_p, w1_p, b1_p, w2_p, b2_p]
    if apply_scale:
        operands.append(s2_p)
    operands.append(t2_p)

    row_map = lambda s, t, *_: (s * tiles_per_shard + t, 0)
    const_map = lambda s, t, *_: (0, 0)
    out_map = lambda s, t, *_: (s, 0, 0)

    def build_in_specs(single_buffer_weights):
        wkw = ({"pipeline_mode": pl.Buffered(1)} if single_buffer_weights
               else {})

        def const_spec(shape):
            return pl.BlockSpec(shape, const_map, **wkw)

        specs = [pl.BlockSpec((tile_n, c_in), row_map),   # xp (streamed rows)
                 const_spec((c_in, h_pad)),               # w1
                 const_spec((1, h_pad)),                  # b1
                 const_spec((h_pad, co_pad)),             # w2 (BN1 folded)
                 const_spec((1, co_pad))]                 # b2
        if apply_scale:
            specs.append(const_spec((1, co_pad)))         # s2
        specs.append(const_spec((1, co_pad)))             # t2
        return specs

    flops = 2 * n * (c_in * hidden + hidden * c_out)
    bytes_accessed = int(sum(int(o.size) * o.dtype.itemsize for o in operands)
                         + 3 * num_tiles * 4 + (num_graphs + 1) * 4
                         + num_shards * b_pad * co_pad * 4)

    kernel = functools.partial(
        _global_sa_kernel, tile_n=tile_n, tiles_per_shard=tiles_per_shard,
        negative_slope=negative_slope, apply_scale=apply_scale)

    def run(single_buffer_weights):
        weight_bufs = 1 if single_buffer_weights else 2
        vmem_need = (2 * tile_n * c_in * 2                         # xp, x2 bufs
                     + weight_bufs * (c_in * h_pad * 2 + h_pad * 4
                                      + h_pad * co_pad * 2 + 3 * co_pad * 4)
                     + 2 * b_pad * 8 * co_pad * 4                  # out slab
                     + tile_n * (h_pad + co_pad) * 4)              # live h
        vmem_limit = int(min(max(vmem_need * 2 + (2 << 20), 16 << 20), 64 << 20))

        call = pl.pallas_call(
            kernel,
            out_shape=jax.ShapeDtypeStruct((num_shards * b_pad, 1, co_pad),
                                           jnp.float32),
            grid_spec=pltpu.PrefetchScalarGridSpec(
                num_scalar_prefetch=3,
                grid=(num_shards, tiles_per_shard),
                in_specs=build_in_specs(single_buffer_weights),
                out_specs=pl.BlockSpec((b_pad, 1, co_pad), out_map)),
            compiler_params=pltpu.CompilerParams(
                dimension_semantics=("parallel", "arbitrary"),
                vmem_limit_bytes=vmem_limit),
            cost_estimate=pl.CostEstimate(
                flops=flops, transcendentals=0, bytes_accessed=bytes_accessed),
        )
        out = call(tile_first, tile_count, seg_off, *operands)
        return jax.block_until_ready(out)

    try:
        slabs = run(single_buffer_weights=True)
    except Exception:
        # pl.Buffered(1) not supported on this jax build: fall back to the
        # default double-buffered constant operands.
        slabs = run(single_buffer_weights=False)

    # Combine per-shard partial maxima and strip lane/sublane padding.
    pooled = slabs.reshape(num_shards, b_pad, co_pad).max(axis=0)
    pooled = pooled[:num_graphs, :c_out]

    out_pos = jnp.zeros((num_graphs, 3), dtype=pos.dtype)
    out_batch = jnp.arange(num_graphs, dtype=jnp.int32)
    return pooled, out_pos, out_batch


def make_params(key, c_in, hidden, c_out, eps=1e-5):
    """Deterministic init of MLP([c_in, hidden, c_out]) = (Lin, LeakyReLU, BN) x2.

    BN (eval mode) is represented as per-channel scale/shift:
        scale = gamma / sqrt(running_var + eps)
        shift = beta - running_mean * scale
    """
    ks = jax.random.split(key, 12)

    def lin(kw, kb, fan_in, fan_out):
        bound = 1.0 / jnp.sqrt(fan_in)
        w = jax.random.uniform(kw, (fan_in, fan_out), jnp.float32, -bound, bound)
        b = jax.random.uniform(kb, (1, fan_out), jnp.float32, -bound, bound)
        return w, b

    def bn(kg, kb, km, kv, c):
        gamma = 1.0 + 0.1 * jax.random.normal(kg, (1, c), jnp.float32)
        beta = 0.1 * jax.random.normal(kb, (1, c), jnp.float32)
        mean = 0.1 * jax.random.normal(km, (1, c), jnp.float32)
        var = jnp.abs(1.0 + 0.1 * jax.random.normal(kv, (1, c), jnp.float32))
        scale = gamma / jnp.sqrt(var + eps)
        shift = beta - mean * scale
        return scale, shift

    w1, b1 = lin(ks[0], ks[1], c_in, hidden)
    s1, t1 = bn(ks[2], ks[3], ks[4], ks[5], hidden)
    w2, b2 = lin(ks[6], ks[7], hidden, c_out)
    s2, t2 = bn(ks[8], ks[9], ks[10], ks[11], c_out)
    return (w1, b1, s1, t1, w2, b2, s2, t2)


def reference(x, pos, batch, params, num_graphs, negative_slope=0.01,
              matmul_dtype=jnp.bfloat16):
    """Pure-JAX reference mirroring the kernel's math (bf16 matmuls, f32 acc)."""
    w1, b1, w2f, b2f, s2, t2, fold_s2 = fold_params(params)
    xp = jnp.concatenate([x, pos], axis=1)

    def dot(a, w):
        return jnp.dot(a.astype(matmul_dtype), w.astype(matmul_dtype),
                       preferred_element_type=jnp.float32)

    h = dot(xp, w1) + b1
    h = jnp.maximum(h, negative_slope * h)
    h = dot(h, w2f) + b2f
    h = jnp.maximum(h, negative_slope * h)
    h = (h + t2) if fold_s2 else (h * s2 + t2)
    out = jnp.full((num_graphs, h.shape[1]), -jnp.inf, jnp.float32)
    return out.at[batch].max(h)


if __name__ == "__main__":
    # Small shapes: B=2 graphs, 8 points each (N=16), C=4 features, hidden=32, out=64.
    key = jax.random.PRNGKey(0)
    k_x, k_pos, k_params = jax.random.split(key, 3)

    B = 2
    N = 16
    C_IN_FEAT = 4
    HIDDEN = 32
    C_OUT = 64

    x = jax.random.normal(k_x, (N, C_IN_FEAT), jnp.float32)
    pos = jax.random.normal(k_pos, (N, 3), jnp.float32)
    batch = jnp.repeat(jnp.arange(B, dtype=jnp.int32), N // B)  # [0]*8 + [1]*8

    params = make_params(k_params, C_IN_FEAT + 3, HIDDEN, C_OUT)

    out_x, out_pos, out_batch = global_sa_module(x, pos, batch, params,
                                                 num_graphs=B)
    jax.block_until_ready((out_x, out_pos, out_batch))

    ref = reference(x, pos, batch, params, B)
    assert out_x.shape == (B, C_OUT)
    assert out_pos.shape == (B, 3) and bool(jnp.all(out_pos == 0))
    assert bool(jnp.all(out_batch == jnp.arange(B)))
    assert bool(jnp.allclose(out_x, ref, atol=2e-3, rtol=2e-3)), (
        float(jnp.max(jnp.abs(out_x - ref))))

    print("KERNEL_OK")
</pallas_src>

<mosaic_0001>
module attributes {stable_mosaic.version = 11 : i64} {
  func.func @_global_sa_kernel(%arg0: i32, %arg1: i32, %arg2: memref<1xi32, #tpu.memory_space<smem>>, %arg3: memref<1xi32, #tpu.memory_space<smem>>, %arg4: memref<3xi32, #tpu.memory_space<smem>>, %arg5: memref<16x7xbf16, #tpu.memory_space<vmem>>, %arg6: memref<7x128xbf16, #tpu.memory_space<vmem>>, %arg7: memref<1x128xf32, #tpu.memory_space<vmem>>, %arg8: memref<128x128xbf16, #tpu.memory_space<vmem>>, %arg9: memref<1x128xf32, #tpu.memory_space<vmem>>, %arg10: memref<1x128xf32, #tpu.memory_space<vmem>>, %arg11: memref<8x1x128xf32, #tpu.memory_space<vmem>>) attributes {dimension_semantics = [#tpu.dimension_semantics<parallel>, #tpu.dimension_semantics<arbitrary>], iteration_bounds = array<i64: 1, 1>, scalar_prefetch = 3 : i64, scratch_operands = 0 : i64, tpu.core_type = #tpu.core_type<tc>, window_params = [{transform_indices = @transform_0, window_bounds = array<i64: 16, 7>}, {pipeline_mode = #tpu.pipeline_mode<synchronous>, transform_indices = @transform_1, window_bounds = array<i64: 7, 128>}, {pipeline_mode = #tpu.pipeline_mode<synchronous>, transform_indices = @transform_2, window_bounds = array<i64: 1, 128>}, {pipeline_mode = #tpu.pipeline_mode<synchronous>, transform_indices = @transform_3, window_bounds = array<i64: 128, 128>}, {pipeline_mode = #tpu.pipeline_mode<synchronous>, transform_indices = @transform_4, window_bounds = array<i64: 1, 128>}, {pipeline_mode = #tpu.pipeline_mode<synchronous>, transform_indices = @transform_5, window_bounds = array<i64: 1, 128>}, {transform_indices = @transform_6, window_bounds = array<i64: 8, 1, 128>}]} {
    %c0_i32 = arith.constant 0 : i32
    %0 = arith.cmpi eq, %arg1, %c0_i32 : i32
    %1 = arith.extui %0 : i1 to i32
    %cst = arith.constant 0xFF800000 : f32
    %c0_i32_0 = arith.constant 0 : i32
    %2 = arith.cmpi ne, %1, %c0_i32_0 : i32
    scf.if %2 {
      %35 = vector.broadcast %cst : f32 to vector<8x1x128xf32>
      %c0_19 = arith.constant 0 : index
      %c0_20 = arith.constant 0 : index
      %c0_21 = arith.constant 0 : index
      %36 = vector.load %arg11[%c0_19, %c0_20, %c0_21] : memref<8x1x128xf32, #tpu.memory_space<vmem>>, vector<8x1x128xf32>
      tpu.vector_store %arg11[%c0_19, %c0_20, %c0_21], %35 {strides = array<i32>} : memref<8x1x128xf32, #tpu.memory_space<vmem>>, vector<8x1x128xf32>,
    } else {
    }
    %c0 = arith.constant 0 : index
    %c0_1 = arith.constant 0 : index
    %3 = vector.load %arg5[%c0, %c0_1] : memref<16x7xbf16, #tpu.memory_space<vmem>>, vector<16x7xbf16>
    %c0_2 = arith.constant 0 : index
    %c0_3 = arith.constant 0 : index
    %4 = vector.load %arg6[%c0_2, %c0_3] : memref<7x128xbf16, #tpu.memory_space<vmem>>, vector<7x128xbf16>
    %cst_4 = arith.constant dense<0.000000e+00> : vector<16x128xf32>
    %5 = tpu.matmul %3, %4, %cst_4 {dimension_numbers = #tpu.dot_dimension_numbers<[1], [0], [0], [1], [0, 0, 1, 1], [], []>} : vector<16x7xbf16>, vector<7x128xbf16>, vector<16x128xf32> -> vector<16x128xf32>
    %c0_5 = arith.constant 0 : index
    %c0_6 = arith.constant 0 : index
    %6 = vector.load %arg7[%c0_5, %c0_6] : memref<1x128xf32, #tpu.memory_space<vmem>>, vector<1x128xf32>
    %7 = vector.broadcast %6 : vector<1x128xf32> to vector<16x128xf32>
    %8 = arith.addf %5, %7 : vector<16x128xf32>
    %cst_7 = arith.constant 0.00999999977 : f32
    %9 = vector.broadcast %cst_7 : f32 to vector<16x128xf32>
    %10 = arith.mulf %9, %8 : vector<16x128xf32>
    %11 = arith.maximumf %8, %10 : vector<16x128xf32>
    %12 = arith.truncf %11 : vector<16x128xf32> to vector<16x128xbf16>
    %c0_8 = arith.constant 0 : index
    %c0_9 = arith.constant 0 : index
    %13 = vector.load %arg8[%c0_8, %c0_9] : memref<128x128xbf16, #tpu.memory_space<vmem>>, vector<128x128xbf16>
    %cst_10 = arith.constant dense<0.000000e+00> : vector<16x128xf32>
    %14 = tpu.matmul %12, %13, %cst_10 {dimension_numbers = #tpu.dot_dimension_numbers<[1], [0], [0], [1], [0, 0, 1, 1], [], []>} : vector<16x128xbf16>, vector<128x128xbf16>, vector<16x128xf32> -> vector<16x128xf32>
    %c0_11 = arith.constant 0 : index
    %c0_12 = arith.constant 0 : index
    %15 = vector.load %arg9[%c0_11, %c0_12] : memref<1x128xf32, #tpu.memory_space<vmem>>, vector<1x128xf32>
    %16 = vector.broadcast %15 : vector<1x128xf32> to vector<16x128xf32>
    %17 = arith.addf %14, %16 : vector<16x128xf32>
    %cst_13 = arith.constant 0.00999999977 : f32
    %18 = vector.broadcast %cst_13 : f32 to vector<16x128xf32>
    %19 = arith.mulf %18, %17 : vector<16x128xf32>
    %20 = arith.maximumf %17, %19 : vector<16x128xf32>
    %c0_14 = arith.constant 0 : index
    %c0_15 = arith.constant 0 : index
    %21 = vector.load %arg10[%c0_14, %c0_15] : memref<1x128xf32, #tpu.memory_space<vmem>>, vector<1x128xf32>
    %22 = vector.broadcast %21 : vector<1x128xf32> to vector<16x128xf32>
    %23 = arith.addf %20, %22 : vector<16x128xf32>
    %c1_i32 = arith.constant 1 : i32
    %24 = arith.muli %arg0, %c1_i32 : i32
    %25 = arith.addi %24, %arg1 : i32
    %c16_i32 = arith.constant 16 : i32
    %26 = arith.muli %25, %c16_i32 : i32
    %27 = tpu.iota {dimensions = array<i32: 0>} : vector<16x1xi32>
    %28 = arith.index_cast %25 : i32 to index
    %29 = memref.load %arg2[%28] : memref<1xi32, #tpu.memory_space<smem>>
    %30 = arith.index_cast %25 : i32 to index
    %31 = memref.load %arg3[%30] : memref<1xi32, #tpu.memory_space<smem>>
    %32 = arith.addi %29, %31 : i32
    %c0_i32_16 = arith.constant 0 : i32
    %cst_17 = arith.constant 0xFF800000 : f32
    %33 = arith.subi %32, %29 : i32
    %34 = arith.addi %29, %33 : i32
    %c1_i32_18 = arith.constant 1 : i32
    scf.for %arg12 = %29 to %34 step %c1_i32_18  : i32 {
      %35 = arith.index_cast %arg12 : i32 to index
      %36 = memref.load %arg4[%35] : memref<3xi32, #tpu.memory_space<smem>>
      %37 = arith.subi %36, %26 : i32
      %c1_i32_19 = arith.constant 1 : i32
      %38 = arith.addi %arg12, %c1_i32_19 : i32
      %39 = arith.index_cast %38 : i32 to index
      %40 = memref.load %arg4[%39] : memref<3xi32, #tpu.memory_space<smem>>
      %41 = arith.subi %40, %26 : i32
      %42 = vector.broadcast %37 : i32 to vector<16x1xi32>
      %43 = arith.cmpi sge, %27, %42 : vector<16x1xi32>
      %44 = vector.broadcast %41 : i32 to vector<16x1xi32>
      %45 = arith.cmpi slt, %27, %44 : vector<16x1xi32>
      %46 = arith.andi %43, %45 : vector<16x1xi1>
      %47 = vector.shape_cast %46 : vector<16x1xi1> to vector<16x1xi1>
      %48 = vector.broadcast %47 : vector<16x1xi1> to vector<16x128xi1>
      %49 = vector.broadcast %cst_17 : f32 to vector<16x128xf32>
      %50 = arith.select %48, %23, %49 : vector<16x128xi1>, vector<16x128xf32>
      %cst_20 = arith.constant dense<0xFF800000> : vector<128xf32>
      %51 = vector.multi_reduction <maximumf>, %50, %cst_20 [0] : vector<16x128xf32> to vector<128xf32>
      %52 = vector.shape_cast %51 : vector<128xf32> to vector<1x128xf32>
      %53 = arith.index_cast %arg12 : i32 to index
      %c0_21 = arith.constant 0 : index
      %c0_22 = arith.constant 0 : index
      %54 = vector.load %arg11[%53, %c0_21, %c0_22] : memref<8x1x128xf32, #tpu.memory_space<vmem>>, vector<1x1x128xf32>
      %55 = vector.shape_cast %54 : vector<1x1x128xf32> to vector<1x128xf32>
      %56 = arith.maximumf %55, %52 : vector<1x128xf32>
      %57 = arith.index_cast %arg12 : i32 to index
      %c0_23 = arith.constant 0 : index
      %c0_24 = arith.constant 0 : index
      %58 = vector.load %arg11[%57, %c0_23, %c0_24] : memref<8x1x128xf32, #tpu.memory_space<vmem>>, vector<1x1x128xf32>
      %59 = vector.shape_cast %58 : vector<1x1x128xf32> to vector<1x128xf32>
      %60 = vector.shape_cast %56 : vector<1x128xf32> to vector<1x1x128xf32>
      tpu.vector_store %arg11[%57, %c0_23, %c0_24], %60 {strides = array<i32>} : memref<8x1x128xf32, #tpu.memory_space<vmem>>, vector<1x1x128xf32>,
    }
    return
  }
  func.func @transform_0(%arg0: i32, %arg1: i32, %arg2: memref<1xi32, #tpu.memory_space<smem>>, %arg3: memref<1xi32, #tpu.memory_space<smem>>, %arg4: memref<3xi32, #tpu.memory_space<smem>>) -> (i32, i32) {
    %c1_i32 = arith.constant 1 : i32
    %0 = arith.muli %arg0, %c1_i32 : i32
    %1 = arith.addi %0, %arg1 : i32
    %c0_i32 = arith.constant 0 : i32
    %c0_i32_0 = arith.constant 0 : i32
    return %1, %c0_i32 : i32, i32
  }
  func.func @transform_1(%arg0: i32, %arg1: i32, %arg2: memref<1xi32, #tpu.memory_space<smem>>, %arg3: memref<1xi32, #tpu.memory_space<smem>>, %arg4: memref<3xi32, #tpu.memory_space<smem>>) -> (i32, i32) {
    %c0_i32 = arith.constant 0 : i32
    %c0_i32_0 = arith.constant 0 : i32
    %c0_i32_1 = arith.constant 0 : i32
    return %c0_i32, %c0_i32_0 : i32, i32
  }
  func.func @transform_2(%arg0: i32, %arg1: i32, %arg2: memref<1xi32, #tpu.memory_space<smem>>, %arg3: memref<1xi32, #tpu.memory_space<smem>>, %arg4: memref<3xi32, #tpu.memory_space<smem>>) -> (i32, i32) {
    %c0_i32 = arith.constant 0 : i32
    %c0_i32_0 = arith.constant 0 : i32
    %c0_i32_1 = arith.constant 0 : i32
    return %c0_i32, %c0_i32_0 : i32, i32
  }
  func.func @transform_3(%arg0: i32, %arg1: i32, %arg2: memref<1xi32, #tpu.memory_space<smem>>, %arg3: memref<1xi32, #tpu.memory_space<smem>>, %arg4: memref<3xi32, #tpu.memory_space<smem>>) -> (i32, i32) {
    %c0_i32 = arith.constant 0 : i32
    %c0_i32_0 = arith.constant 0 : i32
    %c0_i32_1 = arith.constant 0 : i32
    return %c0_i32, %c0_i32_0 : i32, i32
  }
  func.func @transform_4(%arg0: i32, %arg1: i32, %arg2: memref<1xi32, #tpu.memory_space<smem>>, %arg3: memref<1xi32, #tpu.memory_space<smem>>, %arg4: memref<3xi32, #tpu.memory_space<smem>>) -> (i32, i32) {
    %c0_i32 = arith.constant 0 : i32
    %c0_i32_0 = arith.constant 0 : i32
    %c0_i32_1 = arith.constant 0 : i32
    return %c0_i32, %c0_i32_0 : i32, i32
  }
  func.func @transform_5(%arg0: i32, %arg1: i32, %arg2: memref<1xi32, #tpu.memory_space<smem>>, %arg3: memref<1xi32, #tpu.memory_space<smem>>, %arg4: memref<3xi32, #tpu.memory_space<smem>>) -> (i32, i32) {
    %c0_i32 = arith.constant 0 : i32
    %c0_i32_0 = arith.constant 0 : i32
    %c0_i32_1 = arith.constant 0 : i32
    return %c0_i32, %c0_i32_0 : i32, i32
  }
  func.func @transform_6(%arg0: i32, %arg1: i32, %arg2: memref<1xi32, #tpu.memory_space<smem>>, %arg3: memref<1xi32, #tpu.memory_space<smem>>, %arg4: memref<3xi32, #tpu.memory_space<smem>>) -> (i32, i32, i32) {
    %c0_i32 = arith.constant 0 : i32
    %c0_i32_0 = arith.constant 0 : i32
    %c0_i32_1 = arith.constant 0 : i32
    return %arg0, %c0_i32, %c0_i32_0 : i32, i32, i32
  }
}

module attributes {stable_mosaic.version = 11 : i64} {
  func.func @_global_sa_kernel(%arg0: i32, %arg1: i32, %arg2: memref<1xi32, #tpu.memory_space<smem>>, %arg3: memref<1xi32, #tpu.memory_space<smem>>, %arg4: memref<3xi32, #tpu.memory_space<smem>>, %arg5: memref<16x7xbf16, #tpu.memory_space<vmem>>, %arg6: memref<7x128xbf16, #tpu.memory_space<vmem>>, %arg7: memref<1x128xf32, #tpu.memory_space<vmem>>, %arg8: memref<128x128xbf16, #tpu.memory_space<vmem>>, %arg9: memref<1x128xf32, #tpu.memory_space<vmem>>, %arg10: memref<1x128xf32, #tpu.memory_space<vmem>>, %arg11: memref<8x1x128xf32, #tpu.memory_space<vmem>>) attributes {dimension_semantics = [#tpu.dimension_semantics<parallel>, #tpu.dimension_semantics<arbitrary>], iteration_bounds = array<i64: 1, 1>, scalar_prefetch = 3 : i64, scratch_operands = 0 : i64, tpu.core_type = #tpu.core_type<tc>, window_params = [{transform_indices = @transform_0, window_bounds = array<i64: 16, 7>}, {pipeline_mode = #tpu.pipeline_mode<synchronous>, transform_indices = @transform_1, window_bounds = array<i64: 7, 128>}, {pipeline_mode = #tpu.pipeline_mode<synchronous>, transform_indices = @transform_2, window_bounds = array<i64: 1, 128>}, {pipeline_mode = #tpu.pipeline_mode<synchronous>, transform_indices = @transform_3, window_bounds = array<i64: 128, 128>}, {pipeline_mode = #tpu.pipeline_mode<synchronous>, transform_indices = @transform_4, window_bounds = array<i64: 1, 128>}, {pipeline_mode = #tpu.pipeline_mode<synchronous>, transform_indices = @transform_5, window_bounds = array<i64: 1, 128>}, {transform_indices = @transform_6, window_bounds = array<i64: 8, 1, 128>}]} {
    %c0_i32 = arith.constant 0 : i32
    %0 = arith.cmpi eq, %arg1, %c0_i32 : i32
    %1 = arith.extui %0 : i1 to i32
    %cst = arith.constant 0xFF800000 : f32
    %c0_i32_0 = arith.constant 0 : i32
    %2 = arith.cmpi ne, %1, %c0_i32_0 : i32
    scf.if %2 {
      %35 = vector.broadcast %cst : f32 to vector<8x1x128xf32>
      %c0_19 = arith.constant 0 : index
      %c0_20 = arith.constant 0 : index
      %c0_21 = arith.constant 0 : index
      %36 = vector.load %arg11[%c0_19, %c0_20, %c0_21] : memref<8x1x128xf32, #tpu.memory_space<vmem>>, vector<8x1x128xf32>
      tpu.vector_store %arg11[%c0_19, %c0_20, %c0_21], %35 {strides = array<i32>} : memref<8x1x128xf32, #tpu.memory_space<vmem>>, vector<8x1x128xf32>,
    } else {
    }
    %c0 = arith.constant 0 : index
    %c0_1 = arith.constant 0 : index
    %3 = vector.load %arg5[%c0, %c0_1] : memref<16x7xbf16, #tpu.memory_space<vmem>>, vector<16x7xbf16>
    %c0_2 = arith.constant 0 : index
    %c0_3 = arith.constant 0 : index
    %4 = vector.load %arg6[%c0_2, %c0_3] : memref<7x128xbf16, #tpu.memory_space<vmem>>, vector<7x128xbf16>
    %cst_4 = arith.constant dense<0.000000e+00> : vector<16x128xf32>
    %5 = tpu.matmul %3, %4, %cst_4 {dimension_numbers = #tpu.dot_dimension_numbers<[1], [0], [0], [1], [0, 0, 1, 1], [], []>} : vector<16x7xbf16>, vector<7x128xbf16>, vector<16x128xf32> -> vector<16x128xf32>
    %c0_5 = arith.constant 0 : index
    %c0_6 = arith.constant 0 : index
    %6 = vector.load %arg7[%c0_5, %c0_6] : memref<1x128xf32, #tpu.memory_space<vmem>>, vector<1x128xf32>
    %7 = vector.broadcast %6 : vector<1x128xf32> to vector<16x128xf32>
    %8 = arith.addf %5, %7 : vector<16x128xf32>
    %cst_7 = arith.constant 0.00999999977 : f32
    %9 = vector.broadcast %cst_7 : f32 to vector<16x128xf32>
    %10 = arith.mulf %9, %8 : vector<16x128xf32>
    %11 = arith.maximumf %8, %10 : vector<16x128xf32>
    %12 = arith.truncf %11 : vector<16x128xf32> to vector<16x128xbf16>
    %c0_8 = arith.constant 0 : index
    %c0_9 = arith.constant 0 : index
    %13 = vector.load %arg8[%c0_8, %c0_9] : memref<128x128xbf16, #tpu.memory_space<vmem>>, vector<128x128xbf16>
    %cst_10 = arith.constant dense<0.000000e+00> : vector<16x128xf32>
    %14 = tpu.matmul %12, %13, %cst_10 {dimension_numbers = #tpu.dot_dimension_numbers<[1], [0], [0], [1], [0, 0, 1, 1], [], []>} : vector<16x128xbf16>, vector<128x128xbf16>, vector<16x128xf32> -> vector<16x128xf32>
    %c0_11 = arith.constant 0 : index
    %c0_12 = arith.constant 0 : index
    %15 = vector.load %arg9[%c0_11, %c0_12] : memref<1x128xf32, #tpu.memory_space<vmem>>, vector<1x128xf32>
    %16 = vector.broadcast %15 : vector<1x128xf32> to vector<16x128xf32>
    %17 = arith.addf %14, %16 : vector<16x128xf32>
    %cst_13 = arith.constant 0.00999999977 : f32
    %18 = vector.broadcast %cst_13 : f32 to vector<16x128xf32>
    %19 = arith.mulf %18, %17 : vector<16x128xf32>
    %20 = arith.maximumf %17, %19 : vector<16x128xf32>
    %c0_14 = arith.constant 0 : index
    %c0_15 = arith.constant 0 : index
    %21 = vector.load %arg10[%c0_14, %c0_15] : memref<1x128xf32, #tpu.memory_space<vmem>>, vector<1x128xf32>
    %22 = vector.broadcast %21 : vector<1x128xf32> to vector<16x128xf32>
    %23 = arith.addf %20, %22 : vector<16x128xf32>
    %c1_i32 = arith.constant 1 : i32
    %24 = arith.muli %arg0, %c1_i32 : i32
    %25 = arith.addi %24, %arg1 : i32
    %c16_i32 = arith.constant 16 : i32
    %26 = arith.muli %25, %c16_i32 : i32
    %27 = tpu.iota {dimensions = array<i32: 0>} : vector<16x1xi32>
    %28 = arith.index_cast %25 : i32 to index
    %29 = memref.load %arg2[%28] : memref<1xi32, #tpu.memory_space<smem>>
    %30 = arith.index_cast %25 : i32 to index
    %31 = memref.load %arg3[%30] : memref<1xi32, #tpu.memory_space<smem>>
    %32 = arith.addi %29, %31 : i32
    %c0_i32_16 = arith.constant 0 : i32
    %cst_17 = arith.constant 0xFF800000 : f32
    %33 = arith.subi %32, %29 : i32
    %34 = arith.addi %29, %33 : i32
    %c1_i32_18 = arith.constant 1 : i32
    scf.for %arg12 = %29 to %34 step %c1_i32_18  : i32 {
      %35 = arith.index_cast %arg12 : i32 to index
      %36 = memref.load %arg4[%35] : memref<3xi32, #tpu.memory_space<smem>>
      %37 = arith.subi %36, %26 : i32
      %c1_i32_19 = arith.constant 1 : i32
      %38 = arith.addi %arg12, %c1_i32_19 : i32
      %39 = arith.index_cast %38 : i32 to index
      %40 = memref.load %arg4[%39] : memref<3xi32, #tpu.memory_space<smem>>
      %41 = arith.subi %40, %26 : i32
      %42 = vector.broadcast %37 : i32 to vector<16x1xi32>
      %43 = arith.cmpi sge, %27, %42 : vector<16x1xi32>
      %44 = vector.broadcast %41 : i32 to vector<16x1xi32>
      %45 = arith.cmpi slt, %27, %44 : vector<16x1xi32>
      %46 = arith.andi %43, %45 : vector<16x1xi1>
      %47 = vector.shape_cast %46 : vector<16x1xi1> to vector<16x1xi1>
      %48 = vector.broadcast %47 : vector<16x1xi1> to vector<16x128xi1>
      %49 = vector.broadcast %cst_17 : f32 to vector<16x128xf32>
      %50 = arith.select %48, %23, %49 : vector<16x128xi1>, vector<16x128xf32>
      %cst_20 = arith.constant dense<0xFF800000> : vector<128xf32>
      %51 = vector.multi_reduction <maximumf>, %50, %cst_20 [0] : vector<16x128xf32> to vector<128xf32>
      %52 = vector.shape_cast %51 : vector<128xf32> to vector<1x128xf32>
      %53 = arith.index_cast %arg12 : i32 to index
      %c0_21 = arith.constant 0 : index
      %c0_22 = arith.constant 0 : index
      %54 = vector.load %arg11[%53, %c0_21, %c0_22] : memref<8x1x128xf32, #tpu.memory_space<vmem>>, vector<1x1x128xf32>
      %55 = vector.shape_cast %54 : vector<1x1x128xf32> to vector<1x128xf32>
      %56 = arith.maximumf %55, %52 : vector<1x128xf32>
      %57 = arith.index_cast %arg12 : i32 to index
      %c0_23 = arith.constant 0 : index
      %c0_24 = arith.constant 0 : index
      %58 = vector.load %arg11[%57, %c0_23, %c0_24] : memref<8x1x128xf32, #tpu.memory_space<vmem>>, vector<1x1x128xf32>
      %59 = vector.shape_cast %58 : vector<1x1x128xf32> to vector<1x128xf32>
      %60 = vector.shape_cast %56 : vector<1x128xf32> to vector<1x1x128xf32>
      tpu.vector_store %arg11[%57, %c0_23, %c0_24], %60 {strides = array<i32>} : memref<8x1x128xf32, #tpu.memory_space<vmem>>, vector<1x1x128xf32>,
    }
    return
  }
  func.func @transform_0(%arg0: i32, %arg1: i32, %arg2: memref<1xi32, #tpu.memory_space<smem>>, %arg3: memref<1xi32, #tpu.memory_space<smem>>, %arg4: memref<3xi32, #tpu.memory_space<smem>>) -> (i32, i32) {
    %c1_i32 = arith.constant 1 : i32
    %0 = arith.muli %arg0, %c1_i32 : i32
    %1 = arith.addi %0, %arg1 : i32
    %c0_i32 = arith.constant 0 : i32
    %c0_i32_0 = arith.constant 0 : i32
    return %1, %c0_i32 : i32, i32
  }
  func.func @transform_1(%arg0: i32, %arg1: i32, %arg2: memref<1xi32, #tpu.memory_space<smem>>, %arg3: memref<1xi32, #tpu.memory_space<smem>>, %arg4: memref<3xi32, #tpu.memory_space<smem>>) -> (i32, i32) {
    %c0_i32 = arith.constant 0 : i32
    %c0_i32_0 = arith.constant 0 : i32
    %c0_i32_1 = arith.constant 0 : i32
    return %c0_i32, %c0_i32_0 : i32, i32
  }
  func.func @transform_2(%arg0: i32, %arg1: i32, %arg2: memref<1xi32, #tpu.memory_space<smem>>, %arg3: memref<1xi32, #tpu.memory_space<smem>>, %arg4: memref<3xi32, #tpu.memory_space<smem>>) -> (i32, i32) {
    %c0_i32 = arith.constant 0 : i32
    %c0_i32_0 = arith.constant 0 : i32
    %c0_i32_1 = arith.constant 0 : i32
    return %c0_i32, %c0_i32_0 : i32, i32
  }
  func.func @transform_3(%arg0: i32, %arg1: i32, %arg2: memref<1xi32, #tpu.memory_space<smem>>, %arg3: memref<1xi32, #tpu.memory_space<smem>>, %arg4: memref<3xi32, #tpu.memory_space<smem>>) -> (i32, i32) {
    %c0_i32 = arith.constant 0 : i32
    %c0_i32_0 = arith.constant 0 : i32
    %c0_i32_1 = arith.constant 0 : i32
    return %c0_i32, %c0_i32_0 : i32, i32
  }
  func.func @transform_4(%arg0: i32, %arg1: i32, %arg2: memref<1xi32, #tpu.memory_space<smem>>, %arg3: memref<1xi32, #tpu.memory_space<smem>>, %arg4: memref<3xi32, #tpu.memory_space<smem>>) -> (i32, i32) {
    %c0_i32 = arith.constant 0 : i32
    %c0_i32_0 = arith.constant 0 : i32
    %c0_i32_1 = arith.constant 0 : i32
    return %c0_i32, %c0_i32_0 : i32, i32
  }
  func.func @transform_5(%arg0: i32, %arg1: i32, %arg2: memref<1xi32, #tpu.memory_space<smem>>, %arg3: memref<1xi32, #tpu.memory_space<smem>>, %arg4: memref<3xi32, #tpu.memory_space<smem>>) -> (i32, i32) {
    %c0_i32 = arith.constant 0 : i32
    %c0_i32_0 = arith.constant 0 : i32
    %c0_i32_1 = arith.constant 0 : i32
    return %c0_i32, %c0_i32_0 : i32, i32
  }
  func.func @transform_6(%arg0: i32, %arg1: i32, %arg2: memref<1xi32, #tpu.memory_space<smem>>, %arg3: memref<1xi32, #tpu.memory_space<smem>>, %arg4: memref<3xi32, #tpu.memory_space<smem>>) -> (i32, i32, i32) {
    %c0_i32 = arith.constant 0 : i32
    %c0_i32_0 = arith.constant 0 : i32
    %c0_i32_1 = arith.constant 0 : i32
    return %arg0, %c0_i32, %c0_i32_0 : i32, i32, i32
  }
}

</mosaic_0001>

<bundles_post_ra>
// kernel: tpu_custom_call.1
= control target key start
LH: loop header
LB: loop body
LE: loop exit
PB: predicated region body
PF: predicated region fallthrough
CT: control target
= control target key end

     0   :  { %s626_s0 = inlined_call_operand.<no memory space> [shape: s32[1], index: 0, kind: input, shape index: {}]   ;;  %s627_s1 = inlined_call_operand.<no memory space> [shape: s32[1], index: 1, kind: input, shape index: {}]   ;;  %s628_s2 = inlined_call_operand.vmem [shape: s32[3], index: 2, kind: input, shape index: {}]   ;;  %s629_s3 = inlined_call_operand.vmem [shape: bf16[16,7], index: 3, kind: input, shape index: {}]   ;;  %s630_s4 = inlined_call_operand.vmem [shape: bf16[7,128], index: 4, kind: input, shape index: {}]   ;;  %s631_s5 = inlined_call_operand.vmem [shape: f32[1,128], index: 5, kind: input, shape index: {}]   ;;  %s632_s6 = inlined_call_operand.hbm [shape: bf16[128,128], index: 6, kind: input, shape index: {}]   ;;  %s633_s7 = inlined_call_operand.vmem [shape: f32[1,128], index: 7, kind: input, shape index: {}]   ;;  %s634_s8 = inlined_call_operand.vmem [shape: f32[1,128], index: 8, kind: input, shape index: {}]   ;;  %s635_s9 = inlined_call_operand.hbm [shape: f32[8,1,128], index: 9, kind: output, shape index: {}]  }
   0x1   :  { %s16_s11 = sshll.u32 %s628_s2, 4  ;;  %s17_s11 = int_to_ptr.vmem [resolvable:$true] %s16_s11 }
   0x2   :  { %s432_s12 = scalar_lea.vmem %s17_s11, 16  ;;  %p437_p1 = scmp.lt.s32.totalorder %s17_s11, %s17_s11 }
   0x3   :  { %p433_p0 = scmp.ne.s32.totalorder %s17_s11, %s432_s12  ;;  %p438_p2 = scmp.lt.s32.totalorder %s432_s12, %s432_s12 }
   0x5   :  { %p439_p3 = por %p438_p2, %p437_p1 }
   0x7   :  { %p440_p4 = pnand %p439_p3, %p433_p0 }
   0x9   :  { %443 = shalt.err (!%p440_p4)  }
   0xa   :  { %s502_s13 = smov [#allocation5]  }
   0xb   :  { %19 = dma.vmem_to_smem %s17_s11, 16, %s502_s13, [#allocation2] }
   0xc   :  { %492 = dma.done.wait [#allocation2], 16 }
   0xd   :  { %493 = vsyncadd [#allocation2], 4294967280 }
   0xe   :  { %21 = sfence }
   0xf   :  { %22 = vsyncpa [#allocation7], 0 }
  0x10   :  { %23 = vsyncpa [#allocation8], 0  ;;  %s503_s14 = smov [#allocation6]   ;;  %s444_s17 = scalar_lea.hbm %s632_s6, 1024 }
  0x11   :  { %s43_s15 = sshll.u32 %s503_s14, 4  ;;  %p445_p5 = scmp.ne.s32.totalorder %s632_s6, %s444_s17  ;;  %s44_s15 = int_to_ptr.vmem [resolvable:$true] %s43_s15 }
  0x12   :  { %p448_p6 = scmp.lt.u32.totalorder %s444_s17, %s632_s6 }
  0x14   :  { %p450_p7 = pnand %p448_p6, %p445_p5 }
  0x16   :  { %453 = shalt.err (!%p450_p7)
}
  0x17   :  { %s454_s22 = scalar_lea.vmem %s44_s15, 1024  ;;  %p459_p9 = scmp.lt.s32.totalorder %s44_s15, %s44_s15 }
  0x18   :  { %p455_p8 = scmp.ne.s32.totalorder %s44_s15, %s454_s22  ;;  %p460_p10 = scmp.lt.s32.totalorder %s454_s22, %s454_s22 }
  0x1a   :  { %p461_p11 = por %p460_p10, %p459_p9 }
  0x1c   :  { %p462_p12 = pnand %p461_p11, %p455_p8 }
  0x1e   :  { %465 = shalt.err (!%p462_p12)
}
  0x1f   :  { %s504_s23 = smov 64   ;;  %s505_s24 = smov 4  }
  0x20   :  { %49 = dma.hbm_to_vmem [thread:$0]  %s632_s6, 1024, %s44_s15, [#allocation7], %s504_s23, %s504_s23, %s505_s24  }
  0x21   :  { %494 = dma.done.wait [#allocation7], 1024  }
  0x22   :  { %495 = vsyncadd [#allocation7], 4294966272  ;;  %vm103_vm0 = vcmask 1042432   ;;  %v506_v0 = vmov -inf   ;;  %v507_v1 = vmov 0.0   ;;  %vm104_vm1 = vcmask 1043456   ;;  %s593_s12 = sadd.s32 %s627_s1, %s626_s0 }
  0x23   :  { %76 = vst [vmem:[#allocation9] sm:$0x1] %v506_v0  ;;  %77 = vst [vmem:[#allocation9 + $0x1] sm:$0x1] %v506_v0  ;;  %378 = vmatprep.subr.bf16.mxu0 %v507_v1  ;;  %384 = vmatprep.subr.bf16.mxu1 %v507_v1  ;;  %v508_v2 = vmov 65535   ;;  %vm509_vm2 = vmmov 0   ;;  %v283_v28 = vlaneseq  ;;  %p350_p13 = scmp.ge.s32.totalorder %s626_s0, %s593_s12 }
  0x24   :  { %78 = vst [vmem:[#allocation9 + $0x2] sm:$0x1] %v506_v0  ;;  %79 = vst [vmem:[#allocation9 + $0x3] sm:$0x1] %v506_v0  ;;  %v105_v3 = vsel %vm103_vm0, 4294967295, %v508_v2  ;;  %380 = vmatprep.mubr.msk.bf16.mxu0 %vm509_vm2, %v507_v1  ;;  %400 = vmatprep.mubr.msk.bf16.mxu1 %vm509_vm2, %v507_v1  ;;  %v423_v7 = vld [vmem:[%s629_s3] sm:$0xff]  }
  0x25   :  { %80 = vst [vmem:[#allocation9 + $0x4] sm:$0x1] %v506_v0  ;;  %81 = vst [vmem:[#allocation9 + $0x5] sm:$0x1] %v506_v0  ;;  %v106_v4 = vsel %vm104_vm1, %v105_v3, 0  ;;  %v424_v8 = vld [vmem:[#allocation6] sm:$0xff]  }
  0x26   :  { %82 = vst [vmem:[#allocation9 + $0x6] sm:$0x1] %v506_v0  ;;  %83 = vst [vmem:[#allocation9 + $0x7] sm:$0x1] %v506_v0  ;;  %v86_v5 = vld [vmem:[%s630_s4] sm:$0xf]  ;;  %385 = vmatpush3.bf16.msra.mxu1 %v424_v8 }
  0x27   :  { %v108_v6 = vand.u32 %v106_v4, %v86_v5  ;;  %vm99_vm3 = vcmask 56320   ;;  %v425_v9 = vld [vmem:[#allocation6 + $0x8] sm:$0xff]   ;;  %386 = vmatprep.subr.bf16.mxu1 %v507_v1  ;;  %v426_v10 = vld [vmem:[#allocation6 + $0x10] sm:$0xff]   ;;  %v427_v11 = vld [vmem:[#allocation6 + $0x18] sm:$0xff]   ;;  %v284_v29 = vshrl.u32 %v283_v28, 7 }
  0x28   :  { %v428_v12 = vld [vmem:[#allocation6 + $0x20] sm:$0xff]   ;;  %v429_v13 = vld [vmem:[#allocation6 + $0x28] sm:$0xff]   ;;  %v430_v14 = vld [vmem:[#allocation6 + $0x30] sm:$0xff]  }
  0x29   :  { %379 = vmatpush3.bf16.msra.mxu0 %v108_v6  ;;  %v431_v15 = vld [vmem:[#allocation6 + $0x38] sm:$0xff]   ;;  %v354_v16 = vld [vmem:[%s631_s5] ss:$0 sm:$0xff]  ;;  %v285_v30 = vadd.s32 8, %v284_v29 }
  0x2a   :  { %387 = vmatpush3.bf16.msra.mxu1 %v425_v9  ;;  %v357_v31 = vld [vmem:[%s633_s7] ss:$0 sm:$0xff] }
  0x2b   :  { %388 = vmatprep.subr.bf16.mxu1 %v507_v1  ;;  %v366_v39 = vld [vmem:[%s634_s8] ss:$0 sm:$0xff] }
  0x2c   :  { %381 = vmatmul.mubr.msk.bf16.vlgmr.msra.gmra.mrb[0].mxu0 %vm99_vm3, %v423_v7 }
  0x2e   :  { %389 = vmatpush3.bf16.msra.mxu1 %v426_v10 }
  0x2f   :  { %390 = vmatprep.subr.bf16.mxu1 %v507_v1 }
  0x32   :  { %391 = vmatpush3.bf16.msra.mxu1 %v427_v11 }
  0x33   :  { %392 = vmatprep.subr.bf16.mxu1 %v507_v1 }
  0x36   :  { %393 = vmatpush3.bf16.msra.mxu1 %v428_v12 }
  0x37   :  { %394 = vmatprep.subr.bf16.mxu1 %v507_v1 }
  0x3a   :  { %395 = vmatpush3.bf16.msra.mxu1 %v429_v13 }
  0x3b   :  { %396 = vmatprep.subr.bf16.mxu1 %v507_v1 }
  0x3e   :  { %397 = vmatpush3.bf16.msra.mxu1 %v430_v14 }
  0x3f   :  { %398 = vmatprep.subr.bf16.mxu1 %v507_v1 }
  0x42   :  { %399 = vmatpush3.bf16.msra.mxu1 %v431_v15 }
  0xff   :  { %v144_v17 = vpop.f32.mrb[0].mxu0 }
 0x100   :  { %v145_v18 = vadd.f32 %v354_v16, %v144_v17  ;;  %v382_v19 = vpop.f32.mrb[1].mxu0 }
 0x101   :  { %v147_v20 = vpop.f32.mrb[2].mxu0 }
 0x102   :  { %v151_v21 = vmul.f32 0.01, %v145_v18  ;;  %v148_v22 = vadd.f32 %v354_v16, %v147_v20  ;;  %v383_v23 = vpop.f32.mrb[3].mxu0 }
 0x104   :  { %v152_v24 = vmul.f32 0.01, %v148_v22  ;;  %v153_v25 = vmax.f32 %v145_v18, %v151_v21 }
 0x106   :  { %v154_v26 = vmax.f32 %v148_v22, %v152_v24 }
 0x108   :  { %v155_v27 = vpack.c.bf16 %v154_v26, %v153_v25 }
 0x10a   :  { %401 = vmatmul.mubr.bf16.vlgmr.msra.gmra.mrb[0].mxu1 %v155_v27 }
 0x1dd   :  { %v261_v32 = vpop.f32.mrb[0].mxu1 }
 0x1de   :  { %v262_v33 = vadd.f32 %v357_v31, %v261_v32  ;;  %v402_v34 = vpop.f32.mrb[1].mxu1 }
 0x1df   :  { %v264_v35 = vpop.f32.mrb[2].mxu1 }
 0x1e0   :  { %v268_v36 = vmul.f32 0.01, %v262_v33  ;;  %v265_v37 = vadd.f32 %v357_v31, %v264_v35  ;;  %v403_v38 = vpop.f32.mrb[3].mxu1  ;;  %351 = sbr.rel (%p350_p13) target bundleno = 516 (0x204), region = 57 }
 0x1e2   :  { %v270_v40 = vmax.f32 %v262_v33, %v268_v36  ;;  %v269_v41 = vmul.f32 0.01, %v265_v37 }
 0x1e4   :  { %v279_v42 = vadd.f32 %v366_v39, %v270_v40  ;;  %v271_v43 = vmax.f32 %v265_v37, %v269_v41 }
 0x1e6   :  { %v280_v44 = vadd.f32 %v366_v39, %v271_v43 }
 0x1e7 LB: > { %s295_s8 = sld [smem:[#allocation5 + %s500_s0]]  ;;  %s297_s18 = sadd.s32 1, %s500_s0   ;;  %s500_s0 = sphi %s626_s0, %s636_s0  }
 0x1e8   : > { %s298_s19 = sld [smem:[#allocation5 + %s297_s18]]  ;;  %s321_s20 = scalar_lea.vmem [#allocation9], %s500_s0 }
 0x1e9   : > { %v322_v55 = vld [vmem:[%s321_s20] sm:$0x1]  ;;  %p291_p0 = scmp.ge.s32.totalorder %s297_s18, %s593_s12  ;;  %s636_s0 = smov %s297_s18 }
 0x1ed   : > { %v300_v45 = vstv %s295_s8 }
 0x1ee   : > { %vm301_vm4 = vcmp.ge.s32.totalorder %v284_v29, %v300_v45  ;;  %vm302_vm5 = vcmp.ge.s32.totalorder %v285_v30, %v300_v45  ;;  %v303_v46 = vstv %s298_s19 }
 0x1ef   : > { %vm304_vm6 = vcmp.lt.s32.totalorder %v284_v29, %v303_v46  ;;  %vm305_vm7 = vcmp.lt.s32.totalorder %v285_v30, %v303_v46 }
 0x1f0   : > { %vm306_vm8 = vmand %vm301_vm4, %vm304_vm6 }
 0x1f1   : > { %vm307_vm9 = vmand %vm302_vm5, %vm305_vm7  ;;  %v312_v47 = vsel %vm306_vm8, %v279_v42, -inf }
 0x1f2   : > { %v313_v48 = vsel %vm307_vm9, %v280_v44, -inf }
 0x1f3   : > { %v314_v49 = vmax.f32 %v312_v47, %v313_v48 }
 0x1f5   : > { %v315_v50 = vrot.slane %v314_v49, 4 }
 0x1f7   : > { %v316_v51 = vmax.f32 %v314_v49, %v315_v50 }
 0x1f9   : > { %v317_v52 = vrot.slane %v316_v51, 2 }
 0x1fb   : > { %v318_v53 = vmax.f32 %v316_v51, %v317_v52 }
 0x1fd   : > { %v319_v54 = vrot.slane %v318_v53, 1  ;;  %294 = sbr.rel (!%p291_p0) target bundleno = 487 (0x1e7), region = 63 }
 0x1ff   : > { %v320_v56 = vmax.f32 %v318_v53, %v319_v54 }
 0x201   : > { %v323_v57 = vmax.f32 %v322_v55, %v320_v56 }
 0x203   : > { %324 = vst [vmem:[%s321_s20] sm:$0x1] %v323_v57 }
 0x204 PF:  { %s510_s21 = smov [#allocation9]  }
 0x205   :  { %s330_s22 = sshll.u32 %s510_s21, 4  ;;  %s331_s22 = int_to_ptr.vmem [resolvable:$true] %s330_s22 }
 0x206   :  { %s466_s23 = scalar_lea.vmem %s331_s22, 128  ;;  %p471_p2 = scmp.lt.s32.totalorder %s331_s22, %s331_s22 }
 0x207   :  { %p467_p1 = scmp.ne.s32.totalorder %s331_s22, %s466_s23  ;;  %p472_p3 = scmp.lt.s32.totalorder %s466_s23, %s466_s23 }
 0x209   :  { %p473_p4 = por %p472_p3, %p471_p2 }
 0x20b   :  { %p474_p5 = pnand %p473_p4, %p467_p1 }
 0x20d   :  { %477 = shalt.err (!%p474_p5)
}
 0x20e   :  { %s478_s25 = scalar_lea.hbm %s635_s9, 128 }
 0x20f   :  { %p479_p6 = scmp.ne.s32.totalorder %s635_s9, %s478_s25  ;;  %p482_p7 = scmp.lt.u32.totalorder %s478_s25, %s635_s9 }
 0x211   :  { %p484_p8 = pnand %p482_p7, %p479_p6 }
 0x213   :  { %487 = shalt.err (!%p484_p8)
}
 0x214   :  { %s511_s29 = smov 16   ;;  %s512_s3 = smov 1  }
 0x215   :  { %336 = dma.vmem_to_hbm [thread:$0]  %s331_s22, 128, %s635_s9, [#allocation8], %s511_s29, %s511_s29, %s512_s3  }
 0x216   :  { %496 = dma.done.wait [#allocation8], 128  }
 0x217   :  { %497 = vsyncadd [#allocation8], 4294967168 }
 0x218   :  { %340 = vsyncpa [#allocation7], 1 }
 0x219   :  { %341 = vsyncpa [#allocation8], 1 }

// kernel: tpu_custom_call.1
= control target key start
LH: loop header
LB: loop body
LE: loop exit
PB: predicated region body
PF: predicated region fallthrough
CT: control target
= control target key end

     0   :  { %s626_s0 = inlined_call_operand.<no memory space> [shape: s32[1], index: 0, kind: input, shape index: {}]   ;;  %s627_s1 = inlined_call_operand.<no memory space> [shape: s32[1], index: 1, kind: input, shape index: {}]   ;;  %s628_s2 = inlined_call_operand.vmem [shape: s32[3], index: 2, kind: input, shape index: {}]   ;;  %s629_s3 = inlined_call_operand.vmem [shape: bf16[16,7], index: 3, kind: input, shape index: {}]   ;;  %s630_s4 = inlined_call_operand.vmem [shape: bf16[7,128], index: 4, kind: input, shape index: {}]   ;;  %s631_s5 = inlined_call_operand.vmem [shape: f32[1,128], index: 5, kind: input, shape index: {}]   ;;  %s632_s6 = inlined_call_operand.hbm [shape: bf16[128,128], index: 6, kind: input, shape index: {}]   ;;  %s633_s7 = inlined_call_operand.vmem [shape: f32[1,128], index: 7, kind: input, shape index: {}]   ;;  %s634_s8 = inlined_call_operand.vmem [shape: f32[1,128], index: 8, kind: input, shape index: {}]   ;;  %s635_s9 = inlined_call_operand.hbm [shape: f32[8,1,128], index: 9, kind: output, shape index: {}]  }
   0x1   :  { %s16_s11 = sshll.u32 %s628_s2, 4  ;;  %s17_s11 = int_to_ptr.vmem [resolvable:$true] %s16_s11 }
   0x2   :  { %s432_s12 = scalar_lea.vmem %s17_s11, 16  ;;  %p437_p1 = scmp.lt.s32.totalorder %s17_s11, %s17_s11 }
   0x3   :  { %p433_p0 = scmp.ne.s32.totalorder %s17_s11, %s432_s12  ;;  %p438_p2 = scmp.lt.s32.totalorder %s432_s12, %s432_s12 }
   0x5   :  { %p439_p3 = por %p438_p2, %p437_p1 }
   0x7   :  { %p440_p4 = pnand %p439_p3, %p433_p0 }
   0x9   :  { %443 = shalt.err (!%p440_p4)  }
   0xa   :  { %s502_s13 = smov [#allocation5]  }
   0xb   :  { %19 = dma.vmem_to_smem %s17_s11, 16, %s502_s13, [#allocation2] }
   0xc   :  { %492 = dma.done.wait [#allocation2], 16 }
   0xd   :  { %493 = vsyncadd [#allocation2], 4294967280 }
   0xe   :  { %21 = sfence }
   0xf   :  { %22 = vsyncpa [#allocation7], 0 }
  0x10   :  { %23 = vsyncpa [#allocation8], 0  ;;  %s503_s14 = smov [#allocation6]   ;;  %s444_s17 = scalar_lea.hbm %s632_s6, 1024 }
  0x11   :  { %s43_s15 = sshll.u32 %s503_s14, 4  ;;  %p445_p5 = scmp.ne.s32.totalorder %s632_s6, %s444_s17  ;;  %s44_s15 = int_to_ptr.vmem [resolvable:$true] %s43_s15 }
  0x12   :  { %p448_p6 = scmp.lt.u32.totalorder %s444_s17, %s632_s6 }
  0x14   :  { %p450_p7 = pnand %p448_p6, %p445_p5 }
  0x16   :  { %453 = shalt.err (!%p450_p7)
}
  0x17   :  { %s454_s22 = scalar_lea.vmem %s44_s15, 1024  ;;  %p459_p9 = scmp.lt.s32.totalorder %s44_s15, %s44_s15 }
  0x18   :  { %p455_p8 = scmp.ne.s32.totalorder %s44_s15, %s454_s22  ;;  %p460_p10 = scmp.lt.s32.totalorder %s454_s22, %s454_s22 }
  0x1a   :  { %p461_p11 = por %p460_p10, %p459_p9 }
  0x1c   :  { %p462_p12 = pnand %p461_p11, %p455_p8 }
  0x1e   :  { %465 = shalt.err (!%p462_p12)
}
  0x1f   :  { %s504_s23 = smov 64   ;;  %s505_s24 = smov 4  }
  0x20   :  { %49 = dma.hbm_to_vmem [thread:$0]  %s632_s6, 1024, %s44_s15, [#allocation7], %s504_s23, %s504_s23, %s505_s24  }
  0x21   :  { %494 = dma.done.wait [#allocation7], 1024  }
  0x22   :  { %495 = vsyncadd [#allocation7], 4294966272  ;;  %vm103_vm0 = vcmask 1042432   ;;  %v506_v0 = vmov -inf   ;;  %v507_v1 = vmov 0.0   ;;  %vm104_vm1 = vcmask 1043456   ;;  %s593_s12 = sadd.s32 %s627_s1, %s626_s0 }
  0x23   :  { %76 = vst [vmem:[#allocation9] sm:$0x1] %v506_v0  ;;  %77 = vst [vmem:[#allocation9 + $0x1] sm:$0x1] %v506_v0  ;;  %378 = vmatprep.subr.bf16.mxu0 %v507_v1  ;;  %384 = vmatprep.subr.bf16.mxu1 %v507_v1  ;;  %v508_v2 = vmov 65535   ;;  %vm509_vm2 = vmmov 0   ;;  %v283_v28 = vlaneseq  ;;  %p350_p13 = scmp.ge.s32.totalorder %s626_s0, %s593_s12 }
  0x24   :  { %78 = vst [vmem:[#allocation9 + $0x2] sm:$0x1] %v506_v0  ;;  %79 = vst [vmem:[#allocation9 + $0x3] sm:$0x1] %v506_v0  ;;  %v105_v3 = vsel %vm103_vm0, 4294967295, %v508_v2  ;;  %380 = vmatprep.mubr.msk.bf16.mxu0 %vm509_vm2, %v507_v1  ;;  %400 = vmatprep.mubr.msk.bf16.mxu1 %vm509_vm2, %v507_v1  ;;  %v423_v7 = vld [vmem:[%s629_s3] sm:$0xff]  }
  0x25   :  { %80 = vst [vmem:[#allocation9 + $0x4] sm:$0x1] %v506_v0  ;;  %81 = vst [vmem:[#allocation9 + $0x5] sm:$0x1] %v506_v0  ;;  %v106_v4 = vsel %vm104_vm1, %v105_v3, 0  ;;  %v424_v8 = vld [vmem:[#allocation6] sm:$0xff]  }
  0x26   :  { %82 = vst [vmem:[#allocation9 + $0x6] sm:$0x1] %v506_v0  ;;  %83 = vst [vmem:[#allocation9 + $0x7] sm:$0x1] %v506_v0  ;;  %v86_v5 = vld [vmem:[%s630_s4] sm:$0xf]  ;;  %385 = vmatpush3.bf16.msra.mxu1 %v424_v8 }
  0x27   :  { %v108_v6 = vand.u32 %v106_v4, %v86_v5  ;;  %vm99_vm3 = vcmask 56320   ;;  %v425_v9 = vld [vmem:[#allocation6 + $0x8] sm:$0xff]   ;;  %386 = vmatprep.subr.bf16.mxu1 %v507_v1  ;;  %v426_v10 = vld [vmem:[#allocation6 + $0x10] sm:$0xff]   ;;  %v427_v11 = vld [vmem:[#allocation6 + $0x18] sm:$0xff]   ;;  %v284_v29 = vshrl.u32 %v283_v28, 7 }
  0x28   :  { %v428_v12 = vld [vmem:[#allocation6 + $0x20] sm:$0xff]   ;;  %v429_v13 = vld [vmem:[#allocation6 + $0x28] sm:$0xff]   ;;  %v430_v14 = vld [vmem:[#allocation6 + $0x30] sm:$0xff]  }
  0x29   :  { %379 = vmatpush3.bf16.msra.mxu0 %v108_v6  ;;  %v431_v15 = vld [vmem:[#allocation6 + $0x38] sm:$0xff]   ;;  %v354_v16 = vld [vmem:[%s631_s5] ss:$0 sm:$0xff]  ;;  %v285_v30 = vadd.s32 8, %v284_v29 }
  0x2a   :  { %387 = vmatpush3.bf16.msra.mxu1 %v425_v9  ;;  %v357_v31 = vld [vmem:[%s633_s7] ss:$0 sm:$0xff] }
  0x2b   :  { %388 = vmatprep.subr.bf16.mxu1 %v507_v1  ;;  %v366_v39 = vld [vmem:[%s634_s8] ss:$0 sm:$0xff] }
  0x2c   :  { %381 = vmatmul.mubr.msk.bf16.vlgmr.msra.gmra.mrb[0].mxu0 %vm99_vm3, %v423_v7 }
  0x2e   :  { %389 = vmatpush3.bf16.msra.mxu1 %v426_v10 }
  0x2f   :  { %390 = vmatprep.subr.bf16.mxu1 %v507_v1 }
  0x32   :  { %391 = vmatpush3.bf16.msra.mxu1 %v427_v11 }
  0x33   :  { %392 = vmatprep.subr.bf16.mxu1 %v507_v1 }
  0x36   :  { %393 = vmatpush3.bf16.msra.mxu1 %v428_v12 }
  0x37   :  { %394 = vmatprep.subr.bf16.mxu1 %v507_v1 }
  0x3a   :  { %395 = vmatpush3.bf16.msra.mxu1 %v429_v13 }
  0x3b   :  { %396 = vmatprep.subr.bf16.mxu1 %v507_v1 }
  0x3e   :  { %397 = vmatpush3.bf16.msra.mxu1 %v430_v14 }
  0x3f   :  { %398 = vmatprep.subr.bf16.mxu1 %v507_v1 }
  0x42   :  { %399 = vmatpush3.bf16.msra.mxu1 %v431_v15 }
  0xff   :  { %v144_v17 = vpop.f32.mrb[0].mxu0 }
 0x100   :  { %v145_v18 = vadd.f32 %v354_v16, %v144_v17  ;;  %v382_v19 = vpop.f32.mrb[1].mxu0 }
 0x101   :  { %v147_v20 = vpop.f32.mrb[2].mxu0 }
 0x102   :  { %v151_v21 = vmul.f32 0.01, %v145_v18  ;;  %v148_v22 = vadd.f32 %v354_v16, %v147_v20  ;;  %v383_v23 = vpop.f32.mrb[3].mxu0 }
 0x104   :  { %v152_v24 = vmul.f32 0.01, %v148_v22  ;;  %v153_v25 = vmax.f32 %v145_v18, %v151_v21 }
 0x106   :  { %v154_v26 = vmax.f32 %v148_v22, %v152_v24 }
 0x108   :  { %v155_v27 = vpack.c.bf16 %v154_v26, %v153_v25 }
 0x10a   :  { %401 = vmatmul.mubr.bf16.vlgmr.msra.gmra.mrb[0].mxu1 %v155_v27 }
 0x1dd   :  { %v261_v32 = vpop.f32.mrb[0].mxu1 }
 0x1de   :  { %v262_v33 = vadd.f32 %v357_v31, %v261_v32  ;;  %v402_v34 = vpop.f32.mrb[1].mxu1 }
 0x1df   :  { %v264_v35 = vpop.f32.mrb[2].mxu1 }
 0x1e0   :  { %v268_v36 = vmul.f32 0.01, %v262_v33  ;;  %v265_v37 = vadd.f32 %v357_v31, %v264_v35  ;;  %v403_v38 = vpop.f32.mrb[3].mxu1  ;;  %351 = sbr.rel (%p350_p13) target bundleno = 516 (0x204), region = 57 }
 0x1e2   :  { %v270_v40 = vmax.f32 %v262_v33, %v268_v36  ;;  %v269_v41 = vmul.f32 0.01, %v265_v37 }
 0x1e4   :  { %v279_v42 = vadd.f32 %v366_v39, %v270_v40  ;;  %v271_v43 = vmax.f32 %v265_v37, %v269_v41 }
 0x1e6   :  { %v280_v44 = vadd.f32 %v366_v39, %v271_v43 }
 0x1e7 LB: > { %s295_s8 = sld [smem:[#allocation5 + %s500_s0]]  ;;  %s297_s18 = sadd.s32 1, %s500_s0   ;;  %s500_s0 = sphi %s626_s0, %s636_s0  }
 0x1e8   : > { %s298_s19 = sld [smem:[#allocation5 + %s297_s18]]  ;;  %s321_s20 = scalar_lea.vmem [#allocation9], %s500_s0 }
 0x1e9   : > { %v322_v55 = vld [vmem:[%s321_s20] sm:$0x1]  ;;  %p291_p0 = scmp.ge.s32.totalorder %s297_s18, %s593_s12  ;;  %s636_s0 = smov %s297_s18 }
 0x1ed   : > { %v300_v45 = vstv %s295_s8 }
 0x1ee   : > { %vm301_vm4 = vcmp.ge.s32.totalorder %v284_v29, %v300_v45  ;;  %vm302_vm5 = vcmp.ge.s32.totalorder %v285_v30, %v300_v45  ;;  %v303_v46 = vstv %s298_s19 }
 0x1ef   : > { %vm304_vm6 = vcmp.lt.s32.totalorder %v284_v29, %v303_v46  ;;  %vm305_vm7 = vcmp.lt.s32.totalorder %v285_v30, %v303_v46 }
 0x1f0   : > { %vm306_vm8 = vmand %vm301_vm4, %vm304_vm6 }
 0x1f1   : > { %vm307_vm9 = vmand %vm302_vm5, %vm305_vm7  ;;  %v312_v47 = vsel %vm306_vm8, %v279_v42, -inf }
 0x1f2   : > { %v313_v48 = vsel %vm307_vm9, %v280_v44, -inf }
 0x1f3   : > { %v314_v49 = vmax.f32 %v312_v47, %v313_v48 }
 0x1f5   : > { %v315_v50 = vrot.slane %v314_v49, 4 }
 0x1f7   : > { %v316_v51 = vmax.f32 %v314_v49, %v315_v50 }
 0x1f9   : > { %v317_v52 = vrot.slane %v316_v51, 2 }
 0x1fb   : > { %v318_v53 = vmax.f32 %v316_v51, %v317_v52 }
 0x1fd   : > { %v319_v54 = vrot.slane %v318_v53, 1  ;;  %294 = sbr.rel (!%p291_p0) target bundleno = 487 (0x1e7), region = 63 }
 0x1ff   : > { %v320_v56 = vmax.f32 %v318_v53, %v319_v54 }
 0x201   : > { %v323_v57 = vmax.f32 %v322_v55, %v320_v56 }
 0x203   : > { %324 = vst [vmem:[%s321_s20] sm:$0x1] %v323_v57 }
 0x204 PF:  { %s510_s21 = smov [#allocation9]  }
 0x205   :  { %s330_s22 = sshll.u32 %s510_s21, 4  ;;  %s331_s22 = int_to_ptr.vmem [resolvable:$true] %s330_s22 }
 0x206   :  { %s466_s23 = scalar_lea.vmem %s331_s22, 128  ;;  %p471_p2 = scmp.lt.s32.totalorder %s331_s22, %s331_s22 }
 0x207   :  { %p467_p1 = scmp.ne.s32.totalorder %s331_s22, %s466_s23  ;;  %p472_p3 = scmp.lt.s32.totalorder %s466_s23, %s466_s23 }
 0x209   :  { %p473_p4 = por %p472_p3, %p471_p2 }
 0x20b   :  { %p474_p5 = pnand %p473_p4, %p467_p1 }
 0x20d   :  { %477 = shalt.err (!%p474_p5)
}
 0x20e   :  { %s478_s25 = scalar_lea.hbm %s635_s9, 128 }
 0x20f   :  { %p479_p6 = scmp.ne.s32.totalorder %s635_s9, %s478_s25  ;;  %p482_p7 = scmp.lt.u32.totalorder %s478_s25, %s635_s9 }
 0x211   :  { %p484_p8 = pnand %p482_p7, %p479_p6 }
 0x213   :  { %487 = shalt.err (!%p484_p8)
}
 0x214   :  { %s511_s29 = smov 16   ;;  %s512_s3 = smov 1  }
 0x215   :  { %336 = dma.vmem_to_hbm [thread:$0]  %s331_s22, 128, %s635_s9, [#allocation8], %s511_s29, %s511_s29, %s512_s3  }
 0x216   :  { %496 = dma.done.wait [#allocation8], 128  }
 0x217   :  { %497 = vsyncadd [#allocation8], 4294967168 }
 0x218   :  { %340 = vsyncpa [#allocation7], 1 }
 0x219   :  { %341 = vsyncpa [#allocation8], 1 }

</bundles_post_ra>
